<compile_context>
chip_gen: v7x
topology: tpu7x:2x2x1
jax: 0.10.0
libtpu: 0.0.40
codegen_flags: <defaults>
</compile_context>

<pallas_src>
import functools

import jax
import jax.numpy as jnp
from jax import lax
from jax.experimental import pallas as pl
from jax.experimental.pallas import tpu as pltpu


def _ceil_to(x, m):
    return -(-x // m) * m


def _vmem_limit(need_bytes):
    """Clamp the compiler VMEM limit: generous headroom, but safe on v7x (64 MiB/TC)."""
    try:
        cap = int(pltpu.get_tpu_info().vmem_capacity_bytes)
    except Exception:  # conservative default: v7x per-TensorCore capacity
        cap = 64 << 20
    ceiling = min(40 << 20, (cap * 5) // 8)
    return int(min(max(need_bytes * 3 // 2 + (4 << 20), 16 << 20), ceiling))


def _choose_rblk(R, row_bytes, mult, block_bytes):
    """Rows per block: ~block_bytes of input per block; prefer >=8 grid steps when
    each block still moves >= ~512 KiB (megacore balance on v7x); sublane-aligned."""
    rblk = max(1, block_bytes // max(row_bytes, 1))
    eight_way = -(-R // 8)
    if rblk > eight_way and eight_way * row_bytes >= (512 << 10):
        rblk = eight_way
    rblk = max(mult, (rblk // mult) * mult)
    return min(rblk, R)


# --------------------------- Path A: whole row in VMEM ---------------------------

def _nss_row_kernel(pred_ref, fix_ref, out_ref):
    """pred/fix: (rblk, HW) tiles; out: (rblk, 1) per-row NSS value."""
    p = pred_ref[...].astype(jnp.float32)
    m = fix_ref[...].astype(jnp.float32)
    n = jnp.float32(p.shape[-1])

    # Two-pass mean/variance while the tile is resident in VMEM (numerical parity
    # with torch.std's (p - mean)^2 form; extra VALU work is free, kernel is HBM-bound).
    mean = jnp.sum(p, axis=-1, keepdims=True) / n
    d = p - mean
    var = jnp.sum(d * d, axis=-1, keepdims=True) / jnp.float32(p.shape[-1] - 1)
    inv_std = lax.rsqrt(var)  # EUP slot; inf for constant rows (matches torch inf/NaN)

    sum_m = jnp.sum(m, axis=-1, keepdims=True)
    sum_dm = jnp.sum(d * m, axis=-1, keepdims=True)

    nss = -(sum_dm * inv_std) / sum_m
    # rows with no fixations -> 1.0 (the PyTorch "No fixations." branch)
    out_ref[...] = jnp.where(sum_m == 0.0, jnp.float32(1.0), nss)


# ----------------------- Path B: HW-tiled accumulation fallback ------------------

def _nss_acc_kernel(pred_ref, fix_ref, out_ref, sp, sp2, sm, spm, *, hw_total):
    """Fallback for very large H*W.  pred/fix: (rblk, hw_blk); out: (rblk, 1).
    Accumulates per-row sums across the 'arbitrary' HW grid axis in VMEM scratch."""
    j = pl.program_id(1)

    @pl.when(j == 0)
    def _():
        sp[...] = jnp.zeros_like(sp)
        sp2[...] = jnp.zeros_like(sp2)
        sm[...] = jnp.zeros_like(sm)
        spm[...] = jnp.zeros_like(spm)

    p = pred_ref[...].astype(jnp.float32)
    m = fix_ref[...].astype(jnp.float32)
    # Mask columns past the real H*W (partial / padded last HW block).
    col = lax.broadcasted_iota(jnp.int32, p.shape, 1) + j * p.shape[-1]
    valid = col < hw_total
    p = jnp.where(valid, p, 0.0)
    m = jnp.where(valid, m, 0.0)

    sp[...] += jnp.sum(p, axis=-1, keepdims=True)
    sp2[...] += jnp.sum(p * p, axis=-1, keepdims=True)
    sm[...] += jnp.sum(m, axis=-1, keepdims=True)
    spm[...] += jnp.sum(p * m, axis=-1, keepdims=True)

    @pl.when(j == pl.num_programs(1) - 1)
    def _():
        n = jnp.float32(hw_total)
        mean = sp[...] / n
        # single-pass variance (rows never fully resident); clamp tiny negative residue
        var = jnp.maximum(sp2[...] - n * mean * mean, 0.0) / jnp.float32(hw_total - 1)
        inv_std = lax.rsqrt(var)
        sum_m = sm[...]
        nss = -(spm[...] - mean * sum_m) * inv_std / sum_m
        out_ref[...] = jnp.where(sum_m == 0.0, jnp.float32(1.0), nss)


# ------------------------------------ wrapper ------------------------------------

def nss(pred, fixations, *, block_bytes=2 << 20, force_hw_tiling=False):
    """NSS loss.  pred, fixations: (B, C, H, W).  Returns scalar float32.

    Mask contract: pass fixations as int8/uint8 (0/1) to stream 1 B/elem of mask.
    bool is converted here (extra pass -- prefer int8 upstream); float streams as-is.
    """
    B, C, H, W = pred.shape
    R, HW = B * C, H * W

    p = pred.reshape(R, HW)  # free contiguous reshape; dtype upcast happens in-kernel
    f = fixations.reshape(R, HW)
    if f.dtype == jnp.bool_:
        # TODO(synk): have the data pipeline emit int8 masks so this pass disappears.
        f = f.astype(jnp.int8)

    pb = jnp.dtype(p.dtype).itemsize
    fb = jnp.dtype(f.dtype).itemsize
    mult = max(8, 32 // pb, 32 // fb)       # sublane multiple of the narrowest dtype
    hw_pad = _ceil_to(HW, 128)              # lane padding of a VMEM row
    row_bytes = hw_pad * (pb + fb)

    # Path-A feasibility: double-buffered minimum-height row tiles must fit a
    # conservative input budget (12-16 MiB per the v7x guidance).
    input_budget = 16 << 20
    min_rows = min(R, mult)
    use_hw_tiling = force_hw_tiling or (2 * min_rows * row_bytes > input_budget)

    if not use_hw_tiling:
        rblk = _choose_rblk(R, row_bytes, mult, block_bytes)
        nblk = pl.cdiv(R, rblk)
        out_buf = _ceil_to(max(rblk, 8), 8) * 128 * 4       # (rblk,1) lane-padded
        need = 2 * rblk * row_bytes + 2 * out_buf            # 2 pipeline buffers each
        cost = pl.CostEstimate(
            flops=7 * R * HW,
            transcendentals=R,
            bytes_accessed=R * HW * (pb + fb) + 4 * R,
        )
        out = pl.pallas_call(
            _nss_row_kernel,
            out_shape=jax.ShapeDtypeStruct((R, 1), jnp.float32),
            grid_spec=pltpu.PrefetchScalarGridSpec(
                num_scalar_prefetch=0,
                grid=(nblk,),
                in_specs=[
                    pl.BlockSpec((rblk, HW), lambda i: (i, 0)),
                    pl.BlockSpec((rblk, HW), lambda i: (i, 0)),
                ],
                out_specs=pl.BlockSpec((rblk, 1), lambda i: (i, 0)),
            ),
            compiler_params=pltpu.CompilerParams(
                dimension_semantics=("parallel",),
                vmem_limit_bytes=_vmem_limit(need),
            ),
            cost_estimate=cost,
        )(p, f)
    else:
        rblk = min(R, mult)
        hw_blk = max(128, (block_bytes // max(rblk * (pb + fb), 1)) // 128 * 128)
        hw_blk = min(hw_blk, hw_pad)
        nrb = pl.cdiv(R, rblk)
        nhb = pl.cdiv(HW, hw_blk)
        out_buf = _ceil_to(max(rblk, 8), 8) * 128 * 4
        need = 2 * rblk * hw_blk * (pb + fb) + 4 * out_buf + 2 * out_buf
        cost = pl.CostEstimate(
            flops=8 * R * HW,
            transcendentals=R,
            bytes_accessed=R * HW * (pb + fb) + 4 * R,
        )
        kern = functools.partial(_nss_acc_kernel, hw_total=HW)
        out = pl.pallas_call(
            kern,
            out_shape=jax.ShapeDtypeStruct((R, 1), jnp.float32),
            grid_spec=pltpu.PrefetchScalarGridSpec(
                num_scalar_prefetch=0,
                grid=(nrb, nhb),
                in_specs=[
                    pl.BlockSpec((rblk, hw_blk), lambda i, j: (i, j)),
                    pl.BlockSpec((rblk, hw_blk), lambda i, j: (i, j)),
                ],
                out_specs=pl.BlockSpec((rblk, 1), lambda i, j: (i, 0)),
                scratch_shapes=[pltpu.VMEM((rblk, 1), jnp.float32)] * 4,
            ),
            compiler_params=pltpu.CompilerParams(
                dimension_semantics=("parallel", "arbitrary"),
                vmem_limit_bytes=_vmem_limit(need),
            ),
            cost_estimate=cost,
        )(p, f)

    # final mean over the B*C per-row values (tiny glue reduction in plain JAX)
    return jnp.mean(out[:, 0])


def _nss_ref(pred, fixations):
    """Pure-JAX replica of the PyTorch forward, for verification."""
    B, C, H, W = pred.shape
    p = pred.reshape(B * C, H * W).astype(jnp.float32)
    f = fixations.reshape(B * C, H * W).astype(jnp.float32)
    mean = p.mean(-1, keepdims=True)
    std = jnp.sqrt(((p - mean) ** 2).sum(-1, keepdims=True) / (H * W - 1))
    normed = (p - mean) / std
    msum = f.sum(-1)
    per_row = jnp.where(msum == 0.0, 1.0, -(normed * f).sum(-1) / msum)
    return per_row.mean()


if __name__ == "__main__":
    key = jax.random.PRNGKey(0)
    k1, k2, k3, k4 = jax.random.split(key, 4)

    # Main case: small shapes; fixation mask supplied as int8 (preferred contract).
    B, C, H, W = 2, 4, 16, 16
    pred = jax.random.uniform(k1, (B, C, H, W), dtype=jnp.float32)
    fix = (jax.random.uniform(k2, (B, C, H, W)) < 0.1).astype(jnp.int8)
    fix = fix.at[0, 1].set(0)  # exercise the "no fixations" -> 1.0 branch

    out = nss(pred, fix)
    jax.block_until_ready(out)
    ref = _nss_ref(pred, fix)
    assert jnp.allclose(out, ref, atol=1e-5, rtol=1e-5), (out, ref)

    # Exercise the large-H*W fallback path (HW-tiled accumulating kernel) at a
    # small shape by forcing tiling with a tiny block-byte target.
    B2, C2, H2, W2 = 2, 2, 32, 32
    pred2 = jax.random.uniform(k3, (B2, C2, H2, W2), dtype=jnp.float32)
    fix2 = (jax.random.uniform(k4, (B2, C2, H2, W2)) < 0.05).astype(jnp.int8)
    out2 = nss(pred2, fix2, force_hw_tiling=True, block_bytes=16 * 1024)
    jax.block_until_ready(out2)
    ref2 = _nss_ref(pred2, fix2)
    assert jnp.allclose(out2, ref2, atol=1e-5, rtol=1e-5), (out2, ref2)

    print("KERNEL_OK")
</pallas_src>

<mosaic_0001>
module attributes {stable_mosaic.version = 11 : i64} {
  func.func @_nss_row_kernel(%arg0: i32, %arg1: memref<8x256xf32, #tpu.memory_space<vmem>>, %arg2: memref<8x256xi8, #tpu.memory_space<vmem>>, %arg3: memref<8x1xf32, #tpu.memory_space<vmem>>) attributes {dimension_semantics = [#tpu.dimension_semantics<parallel>], iteration_bounds = array<i64: 1>, scalar_prefetch = 0 : i64, scratch_operands = 0 : i64, tpu.core_type = #tpu.core_type<tc>, window_params = [{transform_indices = @transform_0, window_bounds = array<i64: 8, 256>}, {transform_indices = @transform_1, window_bounds = array<i64: 8, 256>}, {transform_indices = @transform_2, window_bounds = array<i64: 8, 1>}]} {
    %c0 = arith.constant 0 : index
    %c0_0 = arith.constant 0 : index
    %0 = vector.load %arg1[%c0, %c0_0] : memref<8x256xf32, #tpu.memory_space<vmem>>, vector<8x256xf32>
    %c0_1 = arith.constant 0 : index
    %c0_2 = arith.constant 0 : index
    %1 = vector.load %arg2[%c0_1, %c0_2] : memref<8x256xi8, #tpu.memory_space<vmem>>, vector<8x256xi8>
    %2 = arith.sitofp %1 : vector<8x256xi8> to vector<8x256xf32>
    %cst = arith.constant dense<0.000000e+00> : vector<8xf32>
    %3 = vector.multi_reduction <add>, %0, %cst [1] : vector<8x256xf32> to vector<8xf32>
    %4 = vector.shape_cast %3 : vector<8xf32> to vector<8x1xf32>
    %cst_3 = arith.constant 2.560000e+02 : f32
    %5 = vector.broadcast %cst_3 : f32 to vector<8x1xf32>
    %6 = arith.divf %4, %5 : vector<8x1xf32>
    %7 = vector.broadcast %6 : vector<8x1xf32> to vector<8x256xf32>
    %8 = arith.subf %0, %7 : vector<8x256xf32>
    %9 = arith.mulf %8, %8 : vector<8x256xf32>
    %cst_4 = arith.constant dense<0.000000e+00> : vector<8xf32>
    %10 = vector.multi_reduction <add>, %9, %cst_4 [1] : vector<8x256xf32> to vector<8xf32>
    %11 = vector.shape_cast %10 : vector<8xf32> to vector<8x1xf32>
    %cst_5 = arith.constant 2.550000e+02 : f32
    %12 = vector.broadcast %cst_5 : f32 to vector<8x1xf32>
    %13 = arith.divf %11, %12 : vector<8x1xf32>
    %14 = math.rsqrt %13 : vector<8x1xf32>
    %cst_6 = arith.constant dense<0.000000e+00> : vector<8xf32>
    %15 = vector.multi_reduction <add>, %2, %cst_6 [1] : vector<8x256xf32> to vector<8xf32>
    %16 = vector.shape_cast %15 : vector<8xf32> to vector<8x1xf32>
    %17 = arith.mulf %8, %2 : vector<8x256xf32>
    %cst_7 = arith.constant dense<0.000000e+00> : vector<8xf32>
    %18 = vector.multi_reduction <add>, %17, %cst_7 [1] : vector<8x256xf32> to vector<8xf32>
    %19 = vector.shape_cast %18 : vector<8xf32> to vector<8x1xf32>
    %20 = arith.mulf %19, %14 : vector<8x1xf32>
    %cst_8 = arith.constant 0.000000e+00 : f32
    %21 = vector.broadcast %cst_8 : f32 to vector<8x1xf32>
    %22 = arith.subf %21, %20 : vector<8x1xf32>
    %23 = arith.divf %22, %16 : vector<8x1xf32>
    %cst_9 = arith.constant 0.000000e+00 : f32
    %24 = vector.broadcast %cst_9 : f32 to vector<8x1xf32>
    %25 = arith.cmpf oeq, %16, %24 : vector<8x1xf32>
    %cst_10 = arith.constant 1.000000e+00 : f32
    %26 = vector.broadcast %cst_10 : f32 to vector<8x1xf32>
    %27 = arith.select %25, %26, %23 : vector<8x1xi1>, vector<8x1xf32>
    %c0_11 = arith.constant 0 : index
    %c0_12 = arith.constant 0 : index
    %28 = vector.load %arg3[%c0_11, %c0_12] : memref<8x1xf32, #tpu.memory_space<vmem>>, vector<8x1xf32>
    tpu.vector_store %arg3[%c0_11, %c0_12], %27 {strides = array<i32>} : memref<8x1xf32, #tpu.memory_space<vmem>>, vector<8x1xf32>,
    return
  }
  func.func @transform_0(%arg0: i32) -> (i32, i32) {
    %c0_i32 = arith.constant 0 : i32
    %c0_i32_0 = arith.constant 0 : i32
    return %arg0, %c0_i32 : i32, i32
  }
  func.func @transform_1(%arg0: i32) -> (i32, i32) {
    %c0_i32 = arith.constant 0 : i32
    %c0_i32_0 = arith.constant 0 : i32
    return %arg0, %c0_i32 : i32, i32
  }
  func.func @transform_2(%arg0: i32) -> (i32, i32) {
    %c0_i32 = arith.constant 0 : i32
    %c0_i32_0 = arith.constant 0 : i32
    return %arg0, %c0_i32 : i32, i32
  }
}

</mosaic_0001>

<bundles_post_ra>
// kernel: tpu_custom_call.1
= control target key start
LH: loop header
LB: loop body
LE: loop exit
PB: predicated region body
PF: predicated region fallthrough
CT: control target
= control target key end

     0   :  { %7 = vsyncpa [#allocation3], 0  ;;  %s177_s0 = inlined_call_operand.hbm [shape: f32[8,256], index: 0, kind: input, shape index: {}]   ;;  %s178_s1 = inlined_call_operand.hbm [shape: s8[8,256], index: 1, kind: input, shape index: {}]   ;;  %s179_s2 = inlined_call_operand.vmem [shape: f32[8,1], index: 2, kind: output, shape index: {}]  }
   0x1   :  { %8 = vsyncpa [#allocation5], 0  ;;  %s133_s9 = smov [#allocation2]   ;;  %s134_s11 = smov [#allocation4]  }
   0x2   :  { %s15_s10 = sshll.u32 %s133_s9, 4  ;;  %s25_s12 = sshll.u32 %s134_s11, 4  ;;  %s16_s10 = int_to_ptr.vmem [resolvable:$true] %s15_s10  ;;  %s26_s12 = int_to_ptr.vmem [resolvable:$true] %s25_s12 }
   0x3   :  { %s85_s15 = scalar_lea.hbm %s177_s0, 256 }
   0x4   :  { %p86_p0 = scmp.ne.s32.totalorder %s177_s0, %s85_s15  ;;  %p89_p1 = scmp.lt.u32.totalorder %s85_s15, %s177_s0 }
   0x6   :  { %p91_p2 = pnand %p89_p1, %p86_p0 }
   0x8   :  { %94 = shalt.err (!%p91_p2)
}
   0x9   :  { %s95_s20 = scalar_lea.vmem %s16_s10, 256  ;;  %p100_p4 = scmp.lt.s32.totalorder %s16_s10, %s16_s10 }
   0xa   :  { %p96_p3 = scmp.ne.s32.totalorder %s16_s10, %s95_s20  ;;  %p101_p5 = scmp.lt.s32.totalorder %s95_s20, %s95_s20 }
   0xc   :  { %p102_p6 = por %p101_p5, %p100_p4 }
   0xe   :  { %p103_p7 = pnand %p102_p6, %p96_p3 }
  0x10   :  { %106 = shalt.err (!%p103_p7)
}
  0x11   :  { %18 = dma.hbm_to_vmem [thread:$0]  %s177_s0, 256, %s16_s10, [#allocation3]  }
  0x12   :  { %s107_s25 = scalar_lea.hbm %s178_s1, 64 }
  0x13   :  { %p108_p8 = scmp.ne.s32.totalorder %s178_s1, %s107_s25  ;;  %p111_p9 = scmp.lt.u32.totalorder %s107_s25, %s178_s1 }
  0x15   :  { %p113_p10 = pnand %p111_p9, %p108_p8 }
  0x17   :  { %116 = shalt.err (!%p113_p10)
}
  0x18   :  { %s117_s30 = scalar_lea.vmem %s26_s12, 64  ;;  %p122_p12 = scmp.lt.s32.totalorder %s26_s12, %s26_s12 }
  0x19   :  { %p118_p11 = scmp.ne.s32.totalorder %s26_s12, %s117_s30  ;;  %p123_p13 = scmp.lt.s32.totalorder %s117_s30, %s117_s30 }
  0x1b   :  { %p124_p0 = por %p123_p13, %p122_p12 }
  0x1d   :  { %p125_p1 = pnand %p124_p0, %p118_p11 }
  0x1f   :  { %128 = shalt.err (!%p125_p1)
}
  0x20   :  { %28 = dma.hbm_to_vmem [thread:$0]  %s178_s1, 64, %s26_s12, [#allocation5]  }
  0x21   :  { %129 = dma.done.wait [#allocation3], 256  }
  0x22   :  { %130 = vsyncadd [#allocation3], 4294967040 }
  0x23   :  { %131 = dma.done.wait [#allocation5], 64  }
  0x24   :  { %132 = vsyncadd [#allocation5], 4294967232  ;;  %v35_v0 = vld [vmem:[#allocation2] sm:$0xff]  ;;  %v36_v1 = vld [vmem:[#allocation2 + $0x8] sm:$0xff]  ;;  %vm71_vm0 = vcmask 7168  }
  0x25   :  { %v42_v2 = vadd.f32 %v36_v1, %v35_v0  ;;  %v37_v3 = vld [vmem:[#allocation4] sm:$0xf] }
  0x26   :  { %v38_v4 = vunpack.c.0.s8 %v37_v3  ;;  %v39_v5 = vunpack.c.1.s8 %v37_v3 }
  0x27   :  { %43 = vadd.xlane.f32.xlu0 %v42_v2 }
  0x28   :  { %v40_v6 = vcvt.s32.f32 %v38_v4  ;;  %v41_v7 = vcvt.s32.f32 %v39_v5 }
  0x2a   :  { %v57_v8 = vadd.f32 %v41_v7, %v40_v6 }
  0x2c   :  { %58 = vadd.xlane.f32.xlu1 %v57_v8 }
  0xb4   :  { %v44_v9 = vpop.xlane.xlu0 %43 }
  0xb5   :  { %v46_v10 = vmul.f32 0.00390625, %v44_v9 }
  0xb7   :  { %v47_v11 = vsub.f32 %v35_v0, %v46_v10  ;;  %v48_v12 = vsub.f32 %v36_v1, %v46_v10 }
  0xb9   :  { %v60_v13 = vmul.f32 %v47_v11, %v40_v6  ;;  %v61_v14 = vmul.f32 %v48_v12, %v41_v7  ;;  %v49_v15 = vmul.f32 %v47_v11, %v47_v11  ;;  %v50_v16 = vmul.f32 %v48_v12, %v48_v12  ;;  %v59_v21 = vpop.xlane.xlu1 %58 }
  0xba   :  { %vm69_vm1 = vcmp.eq.f32.partialorder %v59_v21, 0.0 }
  0xbb   :  { %v62_v17 = vadd.f32 %v61_v14, %v60_v13  ;;  %v51_v18 = vadd.f32 %v50_v16, %v49_v15 }
  0xbd   :  { %63 = vadd.xlane.f32.xlu1 %v62_v17  ;;  %52 = vadd.xlane.f32.xlu0 %v51_v18 }
 0x14a   :  { %v53_v19 = vpop.xlane.xlu0 %52  ;;  %v64_v23 = vpop.xlane.xlu1 %63 }
 0x14b   :  { %v55_v20 = vmul.f32 0.003921569, %v53_v19 }
 0x14d   :  { %81 = vrsqrt.f32 %v55_v20 }
 0x14e   :  { %83 = vrcp.f32 %v59_v21 }
 0x157   :  { %v82_v22 = vpop.eup %81 }
 0x158   :  { %v65_v24 = vmul.f32 %v82_v22, %v64_v23  ;;  %v84_v25 = vpop.eup %83 }
 0x15a   :  { %v66_v26 = vsub.f32 0.0, %v65_v24 }
 0x15c   :  { %v68_v27 = vmul.f32 %v84_v25, %v66_v26 }
 0x15e   :  { %v70_v28 = vsel %vm69_vm1, 1.0, %v68_v27 }
 0x15f   :  { %72 = vst.msk [vmem:[%s179_s2] sm:$0xff] %vm71_vm0, %v70_v28 }
 0x160   :  { %77 = vsyncpa [#allocation3], 1 }
 0x161   :  { %78 = vsyncpa [#allocation5], 1 }

</bundles_post_ra>
